<compile_context>
chip_gen: v7x
topology: tpu7x:2x2x1
jax: 0.10.0
libtpu: 0.0.40
codegen_flags: <defaults>
</compile_context>

<pallas_src>
import math

import jax
import jax.numpy as jnp
from jax.experimental import pallas as pl
from jax.experimental.pallas import tpu as pltpu


_VMEM_LIMIT = 48 * 1024 * 1024  # > default scoped limit, < v7x physical VMEM


# ------------------------------------------------------------------ kernels --

def _fused_bias_kernel(x_ref, w_ref, b_ref, o_ref):
    # x_ref: (TM, K), w_ref: (K, N), b_ref: (1, N) f32, o_ref: (TM, N)
    acc = jnp.dot(x_ref[...], w_ref[...], preferred_element_type=jnp.float32)
    o_ref[...] = (acc + b_ref[...]).astype(o_ref.dtype)


def _fused_nobias_kernel(x_ref, w_ref, o_ref):
    acc = jnp.dot(x_ref[...], w_ref[...], preferred_element_type=jnp.float32)
    o_ref[...] = acc.astype(o_ref.dtype)


def _grouped_bias_kernel(x_ref, w_ref, b_ref, o_ref, acc_ref):
    # x_ref: (1, TM, TK), w_ref: (1, TK, dout), b_ref: (1, 1, dout) f32
    k = pl.program_id(2)

    @pl.when(k == 0)
    def _():
        acc_ref[...] = jnp.zeros_like(acc_ref)

    acc_ref[...] += jnp.dot(x_ref[0], w_ref[0],
                            preferred_element_type=jnp.float32)

    @pl.when(k == pl.num_programs(2) - 1)
    def _():
        o_ref[0] = (acc_ref[...] + b_ref[0]).astype(o_ref.dtype)


def _grouped_nobias_kernel(x_ref, w_ref, o_ref, acc_ref):
    k = pl.program_id(2)

    @pl.when(k == 0)
    def _():
        acc_ref[...] = jnp.zeros_like(acc_ref)

    acc_ref[...] += jnp.dot(x_ref[0], w_ref[0],
                            preferred_element_type=jnp.float32)

    @pl.when(k == pl.num_programs(2) - 1)
    def _():
        o_ref[0] = acc_ref[...].astype(o_ref.dtype)


# ------------------------------------------------------------- tile helpers --

def _pick_tile_m(M, per_row_bytes, budget_bytes, tile_cap=1024):
    """Pick an M tile (multiple of 8) from a VMEM byte budget; return (tm, M_padded)."""
    tm = budget_bytes // max(per_row_bytes, 1)
    tm = int(min(tm, tile_cap))
    tm = max(8, (tm // 8) * 8)
    if M <= tm:
        return M, M  # single full-extent block (always layout-legal)
    mp = ((M + tm - 1) // tm) * tm  # pad so TM | M (keeps DMAs rectangular)
    return tm, mp


def _pick_tile_k(din, cap=512):
    if din <= cap:
        return din
    for tk in (512, 256, 128):
        if din % tk == 0:
            return tk
    return din  # full-K fallback (still legal, just a larger tile)


# ------------------------------------------------------------------ wrapper --

def group_linear_layer(x, weight, bias=None, *, compute_dtype=None,
                       fuse_groups=None):
    """Pallas forward of fairseq GroupLinearLayer.

    x:      (tgt_len, bsz, num_blocks, din)
    weight: (num_blocks, din, dout)
    bias:   (1, 1, num_blocks, dout) or None
    returns (tgt_len, bsz, num_blocks, dout), dtype = x.dtype
    """
    T, B, G, din = x.shape
    gw, din_w, dout = weight.shape
    assert gw == G and din_w == din
    M = T * B
    out_dtype = x.dtype
    cdt = compute_dtype if compute_dtype is not None else x.dtype
    isz = jnp.dtype(cdt).itemsize

    if fuse_groups is None:
        # Fuse groups into a single block-diagonal matmul when the densified
        # weight is small enough to sit comfortably in VMEM.
        fuse_groups = (G * din <= 2048 and G * dout <= 2048
                       and (G * din) * (G * dout) * isz <= (8 << 20))

    if fuse_groups:
        return _forward_fused(x, weight, bias, T, B, G, din, dout, M,
                              out_dtype, cdt)
    return _forward_grouped(x, weight, bias, T, B, G, din, dout, M,
                            out_dtype, cdt)


def _forward_fused(x, weight, bias, T, B, G, din, dout, M, out_dtype, cdt):
    K, N = G * din, G * dout
    isz = jnp.dtype(cdt).itemsize
    osz = jnp.dtype(out_dtype).itemsize

    # (T,B,G,din) -> (M, G*din): free contiguous view, no transpose / HBM copy.
    x2 = x.reshape(M, K).astype(cdt)

    # Block-diagonal weight (G*din, G*dout).  Gated to be at most a few MiB;
    # in a real model this would be built once, not per forward call.
    eye = jnp.eye(G, dtype=weight.dtype)
    w_bd = jnp.einsum("gh,gij->gihj", eye, weight).reshape(K, N).astype(cdt)

    # Double-buffered x/out rows per M-tile; keep room for the resident weight.
    w_bytes = 2 * K * N * isz
    act_budget = max(4 << 20, (28 << 20) - w_bytes)
    per_row = 2 * (K * isz + N * osz)
    tm, mp = _pick_tile_m(M, per_row, act_budget)
    if mp != M:
        x2 = jnp.pad(x2, ((0, mp - M), (0, 0)))

    in_specs = [
        pl.BlockSpec((tm, K), lambda m: (m, 0)),
        pl.BlockSpec((K, N), lambda m: (0, 0)),   # constant index -> resident
    ]
    args = [x2, w_bd]
    if bias is not None:
        in_specs.append(pl.BlockSpec((1, N), lambda m: (0, 0)))
        args.append(bias.reshape(1, N).astype(jnp.float32))
        kernel = _fused_bias_kernel
    else:
        kernel = _fused_nobias_kernel

    bytes_accessed = (mp * K * isz + K * N * isz + mp * N * osz
                      + (N * 4 if bias is not None else 0))
    out2 = pl.pallas_call(
        kernel,
        out_shape=jax.ShapeDtypeStruct((mp, N), out_dtype),
        grid=(mp // tm,),
        in_specs=in_specs,
        out_specs=pl.BlockSpec((tm, N), lambda m: (m, 0)),
        compiler_params=pltpu.CompilerParams(
            dimension_semantics=("parallel",),
            vmem_limit_bytes=_VMEM_LIMIT),
        cost_estimate=pl.CostEstimate(flops=2 * mp * K * N,
                                      transcendentals=0,
                                      bytes_accessed=int(bytes_accessed)),
    )(*args)

    # (M, G*dout) -> (T, B, G, dout): free view again.
    return out2[:M].reshape(T, B, G, dout)


def _forward_grouped(x, weight, bias, T, B, G, din, dout, M, out_dtype, cdt):
    isz = jnp.dtype(cdt).itemsize
    osz = jnp.dtype(out_dtype).itemsize

    tk = _pick_tile_k(din)
    # TODO(synk): add a dout (N) tile for extremely large per-group dout.
    w_bytes = 2 * tk * dout * isz
    act_budget = max(4 << 20, (28 << 20) - w_bytes)
    # per-M-row pipelined bytes: double-buffered x + out rows, plus f32 acc row.
    per_row = 2 * tk * isz + 2 * dout * osz + dout * 4
    tm, mp = _pick_tile_m(M, per_row, act_budget)

    # (T,B,G,din) -> (M,G,din) -> (G,M,din).
    # TODO(synk): this transpose (and the matching one on the output) is an
    # extra HBM round trip; keep activations in (G, M, d) layout in the
    # surrounding model code to drop both.
    x_g = jnp.transpose(x.reshape(M, G, din), (1, 0, 2)).astype(cdt)
    if mp != M:
        x_g = jnp.pad(x_g, ((0, 0), (0, mp - M), (0, 0)))
    w = weight.astype(cdt)
    kt = din // tk if din % tk == 0 else 1

    in_specs = [
        pl.BlockSpec((1, tm, tk), lambda g, m, k: (g, m, k)),
        pl.BlockSpec((1, tk, dout), lambda g, m, k: (g, k, 0)),
    ]
    args = [x_g, w]
    if bias is not None:
        in_specs.append(pl.BlockSpec((1, 1, dout), lambda g, m, k: (g, 0, 0)))
        args.append(bias.reshape(G, 1, dout).astype(jnp.float32))
        kernel = _grouped_bias_kernel
    else:
        kernel = _grouped_nobias_kernel

    bytes_accessed = (G * mp * din * isz + G * din * dout * isz
                      + G * mp * dout * osz
                      + (G * dout * 4 if bias is not None else 0))
    out_g = pl.pallas_call(
        kernel,
        out_shape=jax.ShapeDtypeStruct((G, mp, dout), out_dtype),
        grid=(G, mp // tm, kt),
        in_specs=in_specs,
        out_specs=pl.BlockSpec((1, tm, dout), lambda g, m, k: (g, m, 0)),
        scratch_shapes=[pltpu.VMEM((tm, dout), jnp.float32)],
        compiler_params=pltpu.CompilerParams(
            dimension_semantics=("parallel", "parallel", "arbitrary"),
            vmem_limit_bytes=_VMEM_LIMIT),
        cost_estimate=pl.CostEstimate(flops=2 * G * mp * din * dout,
                                      transcendentals=0,
                                      bytes_accessed=int(bytes_accessed)),
    )(*args)

    return jnp.transpose(out_g[:, :M, :], (1, 0, 2)).reshape(T, B, G, dout)


# --------------------------------------------------------------- parameters --

def init_params(key, num_blocks, din, dout, dtype=jnp.float32):
    # Matches reset_params(): uniform(-stdv, stdv) weight, zero bias.
    stdv = math.sqrt(3.0) * math.sqrt(2.0 / (din + dout))
    weight = jax.random.uniform(
        key, (num_blocks, din, dout), dtype=dtype, minval=-stdv, maxval=stdv)
    bias = jnp.zeros((1, 1, num_blocks, dout), dtype=dtype)
    return weight, bias


if __name__ == "__main__":
    key = jax.random.PRNGKey(0)
    k_x, k_w, k_x2, k_w2 = jax.random.split(key, 4)

    # 1) Demo shapes (fused block-diagonal path, lane-dense N = G*dout = 128).
    tgt_len, bsz, num_blocks, din, dout = 8, 2, 4, 32, 32
    x = jax.random.normal(k_x, (tgt_len, bsz, num_blocks, din), jnp.float32)
    weight, bias = init_params(k_w, num_blocks, din, dout)

    out = jax.block_until_ready(group_linear_layer(x, weight, bias))
    ref = (jnp.einsum("tbgd,gde->tbge", x, weight)
           + bias.reshape(1, 1, num_blocks, dout))
    assert out.shape == (tgt_len, bsz, num_blocks, dout)
    assert jnp.allclose(out, ref, atol=1e-5, rtol=1e-5)

    # 2) Grouped path (forced), no bias, non-square per-group dims.
    t2, b2, g2, din2, dout2 = 4, 2, 3, 160, 96
    x2 = jax.random.normal(k_x2, (t2, b2, g2, din2), jnp.float32)
    w2, _ = init_params(k_w2, g2, din2, dout2)
    out2 = jax.block_until_ready(
        group_linear_layer(x2, w2, None, fuse_groups=False))
    ref2 = jnp.einsum("tbgd,gde->tbge", x2, w2)
    assert out2.shape == (t2, b2, g2, dout2)
    assert jnp.allclose(out2, ref2, atol=1e-3, rtol=1e-3)

    # 3) bf16 compute path (f32 accumulate, f32 bias add), loose tolerance.
    out3 = jax.block_until_ready(
        group_linear_layer(x, weight, bias, compute_dtype=jnp.bfloat16))
    assert jnp.allclose(out3, ref, atol=1e-1, rtol=1e-1)

    print("KERNEL_OK")
</pallas_src>

<mosaic_0001>
module attributes {stable_mosaic.version = 11 : i64} {
  func.func @_fused_bias_kernel(%arg0: i32, %arg1: memref<16x128xf32, #tpu.memory_space<vmem>>, %arg2: memref<128x128xf32, #tpu.memory_space<vmem>>, %arg3: memref<1x128xf32, #tpu.memory_space<vmem>>, %arg4: memref<16x128xf32, #tpu.memory_space<vmem>>) attributes {dimension_semantics = [#tpu.dimension_semantics<parallel>], iteration_bounds = array<i64: 1>, scalar_prefetch = 0 : i64, scratch_operands = 0 : i64, tpu.core_type = #tpu.core_type<tc>, window_params = [{transform_indices = @transform_0, window_bounds = array<i64: 16, 128>}, {pipeline_mode = #tpu.pipeline_mode<synchronous>, transform_indices = @transform_1, window_bounds = array<i64: 128, 128>}, {pipeline_mode = #tpu.pipeline_mode<synchronous>, transform_indices = @transform_2, window_bounds = array<i64: 1, 128>}, {transform_indices = @transform_3, window_bounds = array<i64: 16, 128>}]} {
    %c0 = arith.constant 0 : index
    %c0_0 = arith.constant 0 : index
    %0 = vector.load %arg1[%c0, %c0_0] : memref<16x128xf32, #tpu.memory_space<vmem>>, vector<16x128xf32>
    %c0_1 = arith.constant 0 : index
    %c0_2 = arith.constant 0 : index
    %1 = vector.load %arg2[%c0_1, %c0_2] : memref<128x128xf32, #tpu.memory_space<vmem>>, vector<128x128xf32>
    %cst = arith.constant dense<0.000000e+00> : vector<16x128xf32>
    %2 = tpu.matmul %0, %1, %cst {dimension_numbers = #tpu.dot_dimension_numbers<[1], [0], [0], [1], [0, 0, 1, 1], [], []>} : vector<16x128xf32>, vector<128x128xf32>, vector<16x128xf32> -> vector<16x128xf32>
    %c0_3 = arith.constant 0 : index
    %c0_4 = arith.constant 0 : index
    %3 = vector.load %arg3[%c0_3, %c0_4] : memref<1x128xf32, #tpu.memory_space<vmem>>, vector<1x128xf32>
    %4 = vector.broadcast %3 : vector<1x128xf32> to vector<16x128xf32>
    %5 = arith.addf %2, %4 : vector<16x128xf32>
    %c0_5 = arith.constant 0 : index
    %c0_6 = arith.constant 0 : index
    %6 = vector.load %arg4[%c0_5, %c0_6] : memref<16x128xf32, #tpu.memory_space<vmem>>, vector<16x128xf32>
    tpu.vector_store %arg4[%c0_5, %c0_6], %5 {strides = array<i32>} : memref<16x128xf32, #tpu.memory_space<vmem>>, vector<16x128xf32>,
    return
  }
  func.func @transform_0(%arg0: i32) -> (i32, i32) {
    %c0_i32 = arith.constant 0 : i32
    %c0_i32_0 = arith.constant 0 : i32
    return %arg0, %c0_i32 : i32, i32
  }
  func.func @transform_1(%arg0: i32) -> (i32, i32) {
    %c0_i32 = arith.constant 0 : i32
    %c0_i32_0 = arith.constant 0 : i32
    %c0_i32_1 = arith.constant 0 : i32
    return %c0_i32, %c0_i32_0 : i32, i32
  }
  func.func @transform_2(%arg0: i32) -> (i32, i32) {
    %c0_i32 = arith.constant 0 : i32
    %c0_i32_0 = arith.constant 0 : i32
    %c0_i32_1 = arith.constant 0 : i32
    return %c0_i32, %c0_i32_0 : i32, i32
  }
  func.func @transform_3(%arg0: i32) -> (i32, i32) {
    %c0_i32 = arith.constant 0 : i32
    %c0_i32_0 = arith.constant 0 : i32
    return %arg0, %c0_i32 : i32, i32
  }
}

</mosaic_0001>

<bundles_post_ra>
// kernel: tpu_custom_call.1
= control target key start
LH: loop header
LB: loop body
LE: loop exit
PB: predicated region body
PF: predicated region fallthrough
CT: control target
= control target key end

     0   :  { %8 = vsyncpa [#allocation3], 0  ;;  %s399_s0 = inlined_call_operand.hbm [shape: f32[16,128], index: 0, kind: input, shape index: {}]   ;;  %s400_s1 = inlined_call_operand.hbm [shape: f32[128,128], index: 1, kind: input, shape index: {}]   ;;  %s401_s2 = inlined_call_operand.vmem [shape: f32[1,128], index: 2, kind: input, shape index: {}]   ;;  %s402_s3 = inlined_call_operand.hbm [shape: f32[16,128], index: 3, kind: output, shape index: {}]  }
   0x1   :  { %9 = vsyncpa [#allocation6], 0 }
   0x2   :  { %10 = vsyncpa [#allocation4], 0  ;;  %s326_s12 = smov [#allocation2]   ;;  %s254_s16 = scalar_lea.hbm %s399_s0, 256 }
   0x3   :  { %s16_s13 = sshll.u32 %s326_s12, 4  ;;  %p255_p0 = scmp.ne.s32.totalorder %s399_s0, %s254_s16  ;;  %s17_s13 = int_to_ptr.vmem [resolvable:$true] %s16_s13 }
   0x4   :  { %p258_p1 = scmp.lt.u32.totalorder %s254_s16, %s399_s0 }
   0x6   :  { %p260_p2 = pnand %p258_p1, %p255_p0 }
   0x8   :  { %263 = shalt.err (!%p260_p2)
}
   0x9   :  { %s264_s21 = scalar_lea.vmem %s17_s13, 256  ;;  %p269_p4 = scmp.lt.s32.totalorder %s17_s13, %s17_s13 }
   0xa   :  { %p265_p3 = scmp.ne.s32.totalorder %s17_s13, %s264_s21  ;;  %p270_p5 = scmp.lt.s32.totalorder %s264_s21, %s264_s21 }
   0xc   :  { %p271_p6 = por %p270_p5, %p269_p4 }
   0xe   :  { %p272_p7 = pnand %p271_p6, %p265_p3 }
  0x10   :  { %275 = shalt.err (!%p272_p7)
}
  0x11   :  { %s327_s22 = smov 128   ;;  %s328_s23 = smov 8  }
  0x12   :  { %22 = dma.hbm_to_vmem [thread:$0]  %s399_s0, 256, %s17_s13, [#allocation3], %s327_s22, %s327_s22, %s328_s23  }
  0x13   :  { %s329_s26 = smov [#allocation5]   ;;  %s276_s30 = scalar_lea.hbm %s400_s1, 2048 }
  0x14   :  { %s28_s27 = sshll.u32 %s329_s26, 4  ;;  %p277_p8 = scmp.ne.s32.totalorder %s400_s1, %s276_s30  ;;  %s29_s27 = int_to_ptr.vmem [resolvable:$true] %s28_s27 }
  0x15   :  { %p280_p9 = scmp.lt.u32.totalorder %s276_s30, %s400_s1 }
  0x17   :  { %p282_p10 = pnand %p280_p9, %p277_p8 }
  0x19   :  { %285 = shalt.err (!%p282_p10)
}
  0x1a   :  { %s286_s8 = scalar_lea.vmem %s29_s27, 2048  ;;  %p291_p12 = scmp.lt.s32.totalorder %s29_s27, %s29_s27 }
  0x1b   :  { %p287_p11 = scmp.ne.s32.totalorder %s29_s27, %s286_s8  ;;  %p292_p13 = scmp.lt.s32.totalorder %s286_s8, %s286_s8 }
  0x1d   :  { %p293_p0 = por %p292_p13, %p291_p12 }
  0x1f   :  { %p294_p1 = pnand %p293_p0, %p287_p11 }
  0x21   :  { %297 = shalt.err (!%p294_p1)
}
  0x22   :  { %34 = dma.hbm_to_vmem [thread:$0]  %s400_s1, 2048, %s29_s27, [#allocation6], %s327_s22, %s327_s22, %s328_s23  }
  0x23   :  { %320 = dma.done.wait [#allocation3], 256  }
  0x24   :  { %321 = vsyncadd [#allocation3], 4294967040 }
  0x25   :  { %322 = dma.done.wait [#allocation6], 2048  }
  0x26   :  { %323 = vsyncadd [#allocation6], 4294965248  ;;  %v45_v0 = vld [vmem:[#allocation5] sm:$0xff]  ;;  %v46_v1 = vld [vmem:[#allocation5 + $0x8] sm:$0xff]  ;;  %s330_s11 = smov [#allocation7]  }
  0x27   :  { %v47_v2 = vld [vmem:[#allocation5 + $0x10] sm:$0xff]  ;;  %v217_v3 = vpack.c.bf16 %v46_v1, %v45_v0  ;;  %v48_v4 = vld [vmem:[#allocation5 + $0x18] sm:$0xff]  ;;  %v49_v6 = vld [vmem:[#allocation5 + $0x20] sm:$0xff]  ;;  %s150_s12 = sshll.u32 %s330_s11, 4  ;;  %s151_s12 = int_to_ptr.vmem [resolvable:$true] %s150_s12 }
  0x28   :  { %v221_v5 = vpack.c.bf16 %v48_v4, %v47_v2  ;;  %v50_v7 = vld [vmem:[#allocation5 + $0x28] sm:$0xff]  ;;  %v43_v9 = vld [vmem:[#allocation2] sm:$0xff]  ;;  %v52_v11 = vld [vmem:[#allocation5 + $0x38] sm:$0xff]  ;;  %s298_s13 = scalar_lea.vmem %s151_s12, 256  ;;  %p303_p3 = scmp.lt.s32.totalorder %s151_s12, %s151_s12 }
  0x29   :  { %218 = vmatprep.subr.bf16.mxu0 %v217_v3  ;;  %v225_v8 = vpack.c.bf16 %v50_v7, %v49_v6  ;;  %v51_v10 = vld [vmem:[#allocation5 + $0x30] sm:$0xff]  ;;  %214 = vmatprep.mubr.f32.mxu0 %v43_v9  ;;  %v53_v13 = vld [vmem:[#allocation5 + $0x40] sm:$0xff]  ;;  %v54_v14 = vld [vmem:[#allocation5 + $0x48] sm:$0xff]  ;;  %p299_p2 = scmp.ne.s32.totalorder %s151_s12, %s298_s13  ;;  %p304_p4 = scmp.lt.s32.totalorder %s298_s13, %s298_s13 }
  0x2a   :  { %220 = vmatpush3.bf16.msra.mxu0 %v217_v3  ;;  %v229_v12 = vpack.c.bf16 %v52_v11, %v51_v10  ;;  %v233_v15 = vpack.c.bf16 %v54_v14, %v53_v13  ;;  %v55_v16 = vld [vmem:[#allocation5 + $0x50] sm:$0xff]  ;;  %v56_v17 = vld [vmem:[#allocation5 + $0x58] sm:$0xff]  ;;  %v57_v19 = vld [vmem:[#allocation5 + $0x60] sm:$0xff] }
  0x2b   :  { %222 = vmatprep.subr.bf16.mxu0 %v221_v5  ;;  %v237_v18 = vpack.c.bf16 %v56_v17, %v55_v16  ;;  %v58_v20 = vld [vmem:[#allocation5 + $0x68] sm:$0xff]  ;;  %v59_v22 = vld [vmem:[#allocation5 + $0x70] sm:$0xff]  ;;  %v60_v23 = vld [vmem:[#allocation5 + $0x78] sm:$0xff]  ;;  %p305_p5 = por %p304_p4, %p303_p3 }
  0x2c   :  { %v241_v21 = vpack.c.bf16 %v58_v20, %v57_v19  ;;  %v245_v24 = vpack.c.bf16 %v60_v23, %v59_v22  ;;  %v44_v25 = vld [vmem:[#allocation2 + $0x8] sm:$0xff]  ;;  %v163_v26 = vld [vmem:[%s401_s2] ss:$0 sm:$0xff] }
  0x2d   :  { %p306_p6 = pnand %p305_p5, %p299_p2 }
  0x2e   :  { %224 = vmatpush3.bf16.msra.mxu0 %v221_v5 }
  0x2f   :  { %226 = vmatprep.subr.bf16.mxu0 %v225_v8 }
  0x32   :  { %228 = vmatpush3.bf16.msra.mxu0 %v225_v8 }
  0x33   :  { %230 = vmatprep.subr.bf16.mxu0 %v229_v12 }
  0x36   :  { %232 = vmatpush3.bf16.msra.mxu0 %v229_v12 }
  0x37   :  { %234 = vmatprep.subr.bf16.mxu0 %v233_v15 }
  0x3a   :  { %236 = vmatpush3.bf16.msra.mxu0 %v233_v15 }
  0x3b   :  { %238 = vmatprep.subr.bf16.mxu0 %v237_v18 }
  0x3e   :  { %240 = vmatpush3.bf16.msra.mxu0 %v237_v18 }
  0x3f   :  { %242 = vmatprep.subr.bf16.mxu0 %v241_v21 }
  0x42   :  { %244 = vmatpush3.bf16.msra.mxu0 %v241_v21 }
  0x43   :  { %246 = vmatprep.subr.bf16.mxu0 %v245_v24 }
  0x46   :  { %248 = vmatpush3.bf16.msra.mxu0 %v245_v24 }
  0x49   :  { %215 = vmatmul.mubr.f32.vlgmr.msra.gmra.mrb[0].mxu0 %v44_v25 }
 0x11c   :  { %v216_v27 = vpop.f32.mrb[0].mxu0 }
 0x11d   :  { %v140_v28 = vadd.f32 %v216_v27, %v163_v26  ;;  %v134_v29 = vpop.f32.mrb[1].mxu0 }
 0x11e   :  { %v135_v30 = vadd.f32 %v163_v26, %v134_v29 }
 0x11f   :  { %144 = vst [vmem:[#allocation7 + $0x8] sm:$0xff] %v140_v28 }
 0x120   :  { %143 = vst [vmem:[#allocation7] sm:$0xff] %v135_v30 }
 0x121   :  { %309 = shalt.err (!%p306_p6)
}
 0x122   :  { %s310_s2 = scalar_lea.hbm %s402_s3, 256 }
 0x123   :  { %p311_p7 = scmp.ne.s32.totalorder %s402_s3, %s310_s2  ;;  %p314_p8 = scmp.lt.u32.totalorder %s310_s2, %s402_s3 }
 0x125   :  { %p316_p9 = pnand %p314_p8, %p311_p7 }
 0x127   :  { %319 = shalt.err (!%p316_p9)
}
 0x128   :  { %156 = dma.vmem_to_hbm [thread:$0]  %s151_s12, 256, %s402_s3, [#allocation4], %s327_s22, %s327_s22, %s328_s23  }
 0x129   :  { %324 = dma.done.wait [#allocation4], 256  }
 0x12a   :  { %325 = vsyncadd [#allocation4], 4294967040 }
 0x12b   :  { %160 = vsyncpa [#allocation3], 1 }
 0x12c   :  { %161 = vsyncpa [#allocation6], 1 }
 0x12d   :  { %162 = vsyncpa [#allocation4], 1 }

</bundles_post_ra>
